<compile_context>
chip_gen: v6e
topology: v6e:2x2x1
jax: 0.10.0
libtpu: 0.0.40
codegen_flags: <defaults>
</compile_context>

<pallas_src>
import jax
import jax.numpy as jnp
from jax.experimental import pallas as pl
from jax.experimental.pallas import tpu as pltpu


def _encode_point_kernel(x_ref, wb_ref, o_ref):
    # x_ref : (tm, 3)   lanes = [point_x, point_y, mask]
    # wb_ref: (3, N)    rows  = [weight[:, 0], weight[:, 1], bias]
    # o_ref : (tm, N)
    x = x_ref[...].astype(jnp.float32)
    wb = wb_ref[...].astype(jnp.float32)
    # Pure VPU outer product + bias (no MXU push/pop for a K=2 contraction).
    y = x[:, 0:1] * wb[0:1, :] + x[:, 1:2] * wb[1:2, :] + wb[2:3, :]
    y = y * x[:, 2:3]                               # mask broadcast over features
    o_ref[...] = y.astype(o_ref.dtype)


def _round_up(x, m):
    return ((x + m - 1) // m) * m


def encode_point_conditioning(point, mask, weight, bias, *, tm_max=4096,
                              force_pallas=False, min_pallas_rows=1024):
    """point: (B, S, 2); mask: (B, S); weight: (dim, 2); bias: (dim,)."""
    B, S, K = point.shape
    assert K == 2, "EncodePointConditioning expects 2-D points"
    N = weight.shape[0]
    M = B * S

    out_dtype = jnp.result_type(point.dtype, weight.dtype)

    if not force_pallas and M < min_pallas_rows:
        # Tiny-M fast path: a pallas_call here is 100% launch + DMA overhead.
        # In a real model this op should be fused into its consumer.
        y = point.astype(out_dtype) @ weight.T.astype(out_dtype) + bias.astype(out_dtype)
        return (y * mask[..., None].astype(out_dtype)).astype(out_dtype)

    # Fused activation stream: [px, py, mask] per row -> (M, 3).
    x2d = jnp.concatenate(
        [point.reshape(M, K), mask.reshape(M, 1).astype(point.dtype)], axis=-1)
    # VMEM-resident constant table: [w^T ; bias] -> (3, N) (free 2xN transpose).
    wb = jnp.concatenate(
        [weight.T.astype(out_dtype), bias.reshape(1, N).astype(out_dtype)], axis=0)

    # Tile M with multiple-of-8 tiles; keep >= 2 tiles when possible so the
    # "parallel" grid axis can engage both TensorCores on v7x.
    tm_cap = max(8, (tm_max // 8) * 8)
    if M <= 8:
        tm = M                               # block == full dim is always legal
    else:
        tm = min(tm_cap, _round_up(pl.cdiv(M, 2), 8))
    grid = (pl.cdiv(M, tm),)

    bytes_in = x2d.size * x2d.dtype.itemsize + wb.size * wb.dtype.itemsize
    bytes_out = M * N * jnp.dtype(out_dtype).itemsize

    out2d = pl.pallas_call(
        _encode_point_kernel,
        out_shape=jax.ShapeDtypeStruct((M, N), out_dtype),
        grid=grid,
        in_specs=[
            pl.BlockSpec((tm, 3), lambda i: (i, 0)),   # fused act+mask stream
            pl.BlockSpec((3, N), lambda i: (0, 0)),    # weight+bias, VMEM-resident
        ],
        out_specs=pl.BlockSpec((tm, N), lambda i: (i, 0)),
        compiler_params=pltpu.CompilerParams(
            dimension_semantics=("parallel",),
        ),
        cost_estimate=pl.CostEstimate(
            flops=5 * M * N,
            transcendentals=0,
            bytes_accessed=bytes_in + bytes_out,
        ),
    )(x2d, wb)

    return out2d.reshape(B, S, N)


if __name__ == "__main__":
    # Small shapes consistent with the module: B=2, S=8, point_dim=2, dim=32.
    B, S, POINT_DIM, DIM = 2, 8, 2, 32

    key = jax.random.PRNGKey(0)
    k_pt, k_mask, k_w, k_b = jax.random.split(key, 4)

    point = jax.random.normal(k_pt, (B, S, POINT_DIM), dtype=jnp.float32)
    mask = (jax.random.uniform(k_mask, (B, S)) > 0.3).astype(jnp.float32)

    # nn.Linear(2, dim): weight (dim, 2), bias (dim,)
    bound = 1.0 / (POINT_DIM ** 0.5)
    weight = jax.random.uniform(k_w, (DIM, POINT_DIM), minval=-bound, maxval=bound,
                                dtype=jnp.float32)
    bias = jax.random.uniform(k_b, (DIM,), minval=-bound, maxval=bound,
                              dtype=jnp.float32)

    ref = (point @ weight.T + bias) * mask[..., None]

    # 1) Native tiny shape, forced through the Pallas kernel (2 tiles of 8 rows).
    out = encode_point_conditioning(point, mask, weight, bias, force_pallas=True)
    out = jax.block_until_ready(out)
    assert out.shape == (B, S, DIM)
    assert jnp.allclose(out, ref, atol=1e-5, rtol=1e-5)

    # 2) Default path at tiny M (jnp fast path), identical semantics.
    out_fast = jax.block_until_ready(encode_point_conditioning(point, mask, weight, bias))
    assert jnp.allclose(out_fast, ref, atol=1e-5, rtol=1e-5)

    # 3) Larger multi-tile run (partial last block) to exercise the pipeline.
    B2, S2 = 4, 600                      # M = 2400 -> 5 tiles of 512 rows
    point2 = jax.random.normal(k_pt, (B2, S2, POINT_DIM), dtype=jnp.float32)
    mask2 = (jax.random.uniform(k_mask, (B2, S2)) > 0.5).astype(jnp.float32)
    out2 = encode_point_conditioning(point2, mask2, weight, bias,
                                     force_pallas=True, tm_max=512)
    out2 = jax.block_until_ready(out2)
    ref2 = (point2 @ weight.T + bias) * mask2[..., None]
    assert out2.shape == (B2, S2, DIM)
    assert jnp.allclose(out2, ref2, atol=1e-5, rtol=1e-5)

    print("KERNEL_OK")
</pallas_src>

<mosaic_0001>
module attributes {stable_mosaic.version = 11 : i64} {
  func.func @_encode_point_kernel(%arg0: i32, %arg1: memref<8x3xf32, #tpu.memory_space<vmem>>, %arg2: memref<3x32xf32, #tpu.memory_space<vmem>>, %arg3: memref<8x32xf32, #tpu.memory_space<vmem>>) attributes {dimension_semantics = [#tpu.dimension_semantics<parallel>], iteration_bounds = array<i64: 2>, scalar_prefetch = 0 : i64, scratch_operands = 0 : i64, tpu.core_type = #tpu.core_type<tc>, window_params = [{transform_indices = @transform_0, window_bounds = array<i64: 8, 3>}, {pipeline_mode = #tpu.pipeline_mode<synchronous>, transform_indices = @transform_1, window_bounds = array<i64: 3, 32>}, {transform_indices = @transform_2, window_bounds = array<i64: 8, 32>}]} {
    %c0 = arith.constant 0 : index
    %c0_0 = arith.constant 0 : index
    %0 = vector.load %arg1[%c0, %c0_0] : memref<8x3xf32, #tpu.memory_space<vmem>>, vector<8x3xf32>
    %c0_1 = arith.constant 0 : index
    %c0_2 = arith.constant 0 : index
    %1 = vector.load %arg2[%c0_1, %c0_2] : memref<3x32xf32, #tpu.memory_space<vmem>>, vector<3x32xf32>
    %2 = vector.extract_strided_slice %0 {offsets = [0, 0], sizes = [8, 1], strides = [1, 1]} : vector<8x3xf32> to vector<8x1xf32>
    %3 = vector.extract_strided_slice %1 {offsets = [0, 0], sizes = [1, 32], strides = [1, 1]} : vector<3x32xf32> to vector<1x32xf32>
    %4 = vector.broadcast %2 : vector<8x1xf32> to vector<8x32xf32>
    %5 = vector.broadcast %3 : vector<1x32xf32> to vector<8x32xf32>
    %6 = arith.mulf %4, %5 : vector<8x32xf32>
    %7 = vector.extract_strided_slice %0 {offsets = [0, 1], sizes = [8, 1], strides = [1, 1]} : vector<8x3xf32> to vector<8x1xf32>
    %8 = vector.extract_strided_slice %1 {offsets = [1, 0], sizes = [1, 32], strides = [1, 1]} : vector<3x32xf32> to vector<1x32xf32>
    %9 = vector.broadcast %7 : vector<8x1xf32> to vector<8x32xf32>
    %10 = vector.broadcast %8 : vector<1x32xf32> to vector<8x32xf32>
    %11 = arith.mulf %9, %10 : vector<8x32xf32>
    %12 = arith.addf %6, %11 : vector<8x32xf32>
    %13 = vector.extract_strided_slice %1 {offsets = [2, 0], sizes = [1, 32], strides = [1, 1]} : vector<3x32xf32> to vector<1x32xf32>
    %14 = vector.broadcast %13 : vector<1x32xf32> to vector<8x32xf32>
    %15 = arith.addf %12, %14 : vector<8x32xf32>
    %16 = vector.extract_strided_slice %0 {offsets = [0, 2], sizes = [8, 1], strides = [1, 1]} : vector<8x3xf32> to vector<8x1xf32>
    %17 = vector.broadcast %16 : vector<8x1xf32> to vector<8x32xf32>
    %18 = arith.mulf %15, %17 : vector<8x32xf32>
    %c0_3 = arith.constant 0 : index
    %c0_4 = arith.constant 0 : index
    %19 = vector.load %arg3[%c0_3, %c0_4] : memref<8x32xf32, #tpu.memory_space<vmem>>, vector<8x32xf32>
    tpu.vector_store %arg3[%c0_3, %c0_4], %18 {strides = array<i32>} : memref<8x32xf32, #tpu.memory_space<vmem>>, vector<8x32xf32>,
    return
  }
  func.func @transform_0(%arg0: i32) -> (i32, i32) {
    %c0_i32 = arith.constant 0 : i32
    %c0_i32_0 = arith.constant 0 : i32
    return %arg0, %c0_i32 : i32, i32
  }
  func.func @transform_1(%arg0: i32) -> (i32, i32) {
    %c0_i32 = arith.constant 0 : i32
    %c0_i32_0 = arith.constant 0 : i32
    %c0_i32_1 = arith.constant 0 : i32
    return %c0_i32, %c0_i32_0 : i32, i32
  }
  func.func @transform_2(%arg0: i32) -> (i32, i32) {
    %c0_i32 = arith.constant 0 : i32
    %c0_i32_0 = arith.constant 0 : i32
    return %arg0, %c0_i32 : i32, i32
  }
}

</mosaic_0001>

<bundles_post_ra>
// kernel: tpu_custom_call.1
= control target key start
LH: loop header
LB: loop body
LE: loop exit
PB: predicated region body
PF: predicated region fallthrough
CT: control target
= control target key end

     0   :  { %7 = vsyncpa [#allocation3], 0  ;;  %s473_s0 = inlined_call_operand.vmem [shape: f32[16,3], index: 0, kind: input, shape index: {}]   ;;  %s474_s1 = inlined_call_operand.vmem [shape: f32[3,32], index: 1, kind: input, shape index: {}]   ;;  %s475_s2 = inlined_call_operand.hbm [shape: f32[16,32], index: 2, kind: output, shape index: {}]  }
   0x1   :  { %9 = vsyncpa [#allocation3 + $0x1], 0  ;;  %s383_s9 = smov 0   ;;  %s385_s10 = smov 0  }
   0x2   :  { %s387_s11 = smov 0   ;;  %s389_s12 = smov 0  }
   0x3 LB: > { %s404_s13 = sadd.s32 4294967295, %s362_s12   ;;  %s246_s14 = sadd.s32 4294967294, %s362_s12   ;;  %s362_s12 = sphi %s389_s12, %s481_s12   ;;  %s358_s11 = sphi %s387_s11, %s480_s11   ;;  %s354_s10 = sphi %s385_s10, %s479_s10   ;;  %s350_s9 = sphi %s383_s9, %s478_s9  }
   0x4   : > { %s408_s15 = sadd.s32 1, %s362_s12   ;;  %s69_s16 = sadd.s32 1, %s358_s11 }
   0x5   : > { %s66_s17 = ssub.s32 %s362_s12, %s408_s15  ;;  %p79_p0 = scmp.ne.s32.totalorder %s358_s11, %s354_s10 }
   0x6   : > { %p67_p1 = scmp.eq.s32.totalorder %s66_s17, 0  ;;  %p80_p2 = scmp.eq.s32.totalorder %s404_s13, 1 }
   0x7   : > { %p85_p3 = scmp.ne.s32.totalorder %s354_s10, %s350_s9  ;;  %p86_p4 = scmp.eq.s32.totalorder %s246_s14, 1 }
   0x8   : > { %s419_s18 = scalar_select %p67_p1, %s358_s11, %s69_s16  }
   0x9   : > { %p421_p5 = por %p80_p2, %p79_p0  ;;  %p425_p6 = por %p86_p4, %p85_p3 }
   0xa   : > { %p249_p7 = scmp.ge.s32.totalorder %s362_s12, 1  ;;  %p114_p8 = scmp.lt.s32.totalorder %s362_s12, 3 }
   0xc   : > { %p115_p9 = pnand %p249_p7, %p114_p8 }
   0xd   : > { %p135_p10 = scmp.lt.s32.totalorder (!%p115_p9), %s404_s13, 1  ;;  %s132_s28 = sand.u32 (!%p115_p9), 1, %s354_s10  }
   0xe   : > { %118 = sbr.rel (%p115_p9) target bundleno = 174 (0xae), region = 28  ;;  %s250_s29 = sshll.u32 (!%p115_p9), %s132_s28, 3 }
   0xf   : > { %s253_s30 = sshll.u32 (!%p115_p9), %s404_s13, 7  ;;  %s134_s3 = scalar_lea.vmem (!%p115_p9), [#allocation2], %s250_s29 }
  0x10   : > { %s187_s4 = sshll.u32 (!%p115_p9), %s134_s3, 4  ;;  %s185_s7 = scalar_lea.hbm (!%p115_p9), %s475_s2, %s253_s30  ;;  %s188_s4 = int_to_ptr.vmem [resolvable:$true] %s187_s4 }
  0x11   : > { %s174_s8 = scalar_lea.sflag (!%p115_p9), [#allocation3], %s132_s28  ;;  %s302_s14 = scalar_lea.vmem (!%p115_p9), %s188_s4, 128 }
  0x12   : > { %p303_p11 = scmp.ne.s32.totalorder (!%p115_p9), %s188_s4, %s302_s14  ;;  %s367_s16 = smov (!%p115_p9), [#allocation2]  }
  0x13   : > { %v364_v0 = vmov 0   ;;  %v365_v1 = vmov 2   ;;  %s136_s21 = scalar_select %p135_p10, %s404_s13, 1  ;;  %v366_v3 = vmov 1   ;;  %v146_v4 = vlaneseq  ;;  %v140_v8 = vld [vmem:[%s474_s1] sm:$0x7] }
  0x14   : > { %298 = vset.pattern.permute.xlu0 %v364_v0  ;;  %300 = vset.pattern.permute.xlu1 %v365_v1  ;;  %vm171_vm0 = vcmask 261120   ;;  %p304_p12 = pnand %p303_p11, %p421_p5  ;;  %s306_s17 = sshll.u32 %s367_s16, 4  ;;  %s307_s17 = int_to_ptr.vmem [resolvable:$false] %s306_s17 }
  0x15   : > { %s251_s22 = sshll.u32 %s136_s21, 3  ;;  %v147_v5 = vshrl.u32 %v146_v4, 7  ;;  %s308_s13 = scalar_lea.vmem %s307_s17, 256 }
  0x16   : > { %s138_s25 = scalar_lea.vmem %s473_s0, %s251_s22  ;;  %p305_p13 = pneg %p304_p12 }
  0x17   : > { %v139_v2 = vld [vmem:[%s138_s25] sm:$0xff]  ;;  %v148_v6 = vsub.s32 0, %v147_v5  ;;  %v157_v7 = vsub.s32 1, %v147_v5  ;;  %v163_v12 = vsub.s32 2, %v147_v5  ;;  %p309_p0 = scmp.lt.s32.totalorder %s188_s4, %s307_s17  ;;  %p310_p1 = scmp.lt.s32.totalorder %s308_s13, %s302_s14 }
  0x18   : > { %143 = vperm.xlu0 %298, %v139_v2   ;;  %167 = vperm.xlu1 %300, %v139_v2  }
  0x19   : > { %v149_v10 = vrot.slane %v140_v8, %v148_v6  ;;  %v158_v11 = vrot.slane %v140_v8, %v157_v7  ;;  %v164_v16 = vrot.slane %v140_v8, %v163_v12  ;;  %p311_p2 = por %p310_p1, %p309_p0 }
  0x1b   : > { %p312_p3 = pnand %p311_p2, %p305_p13 }
  0x1c   : > { %299 = vset.pattern.permute.xlu0 %v366_v3 }
  0x1d   : > { %152 = vperm.xlu0 %299, %v139_v2  }
  0x21   : > { %301 = vset.pattern.permute.xlu0 %v365_v1 }
  0x93   : > { %v144_v9 = vpop.permute.xlu0 %143  ;;  %v168_v18 = vpop.permute.xlu1 %167 }
  0x94   : > { %v150_v14 = vmul.f32 %v149_v10, %v144_v9 }
  0x98   : > { %v153_v13 = vpop.permute.xlu0 %152 }
  0x99   : > { %v159_v15 = vmul.f32 %v158_v11, %v153_v13 }
  0x9b   : > { %v160_v17 = vadd.f32 %v159_v15, %v150_v14 }
  0x9d   : > { %v165_v19 = vadd.f32 %v164_v16, %v160_v17 }
  0x9f   : > { %v170_v20 = vmul.f32 %v168_v18, %v165_v19 }
  0xa1   : > { %172 = vst.msk [vmem:[%s134_s3] sm:$0xff] %vm171_vm0, %v170_v20 }
  0xa2   : > { %315 = shalt.err (!%p312_p3)
}
  0xa3   : > { %s316_s21 = scalar_lea.hbm %s185_s7, 128  ;;  %s320_s24 = scalar_lea.hbm %s475_s2, 256 }
  0xa4   : > { %p317_p4 = scmp.ne.s32.totalorder %s185_s7, %s316_s21  ;;  %p321_p9 = scmp.lt.s32.totalorder %s185_s7, %s475_s2 }
  0xa5   : > { %p322_p10 = scmp.lt.s32.totalorder %s320_s24, %s316_s21 }
  0xa6   : > { %p318_p7 = pnand %p317_p4, %p421_p5 }
  0xa7   : > { %p323_p11 = por %p322_p10, %p321_p9 }
  0xa8   : > { %p319_p8 = pneg %p318_p7 }
  0xaa   : > { %p324_p12 = pnand %p323_p11, %p319_p8 }
  0xac   : > { %327 = shalt.err (!%p324_p12)
}
  0xad   : > { %256 = dma.vmem_to_hbm [thread:$0]  (%p421_p5), %s188_s4, 128, %s185_s7, %s174_s8  }
  0xae PF: > { %p262_p13 = scmp.ge.s32.totalorder %s362_s12, 2  ;;  %s199_s27 = sand.u32 1, %s350_s9  }
  0xaf   : > { %s200_s28 = scalar_lea.sflag [#allocation3], %s199_s27 }
  0xb0   : > { %p259_p0 = pnand %p262_p13, %p425_p6 }
  0xb2   : > { %p260_p1 = pneg %p259_p0 }
  0xb4   : > { %345 = dma.done.wait (%p260_p1), %s200_s28, 128  }
  0xb5   : > { %347 = vsyncadd (%p260_p1), %s200_s28, 4294967168  ;;  %p12_p2 = scmp.ge.s32.totalorder %s408_s15, 4   ;;  %s478_s9 = smov %s354_s10 }
  0xb6   : > { %s479_s10 = smov %s358_s11  ;;  %s480_s11 = smov %s419_s18 }
  0xb7   : > { %s481_s12 = smov %s408_s15  ;;  %14 = sbr.rel (!%p12_p2) target bundleno = 3 (0x3), region = 63 }
  0xbc   :  { %205 = vsyncpa [#allocation3], 1 }
  0xbd   :  { %207 = vsyncpa [#allocation3 + $0x1], 1 }

</bundles_post_ra>
